<compile_context>
chip_gen: v6e
topology: v6e:2x2x1
jax: 0.10.0
libtpu: 0.0.40
codegen_flags: <defaults>
</compile_context>

<pallas_src>
import jax
import jax.numpy as jnp
from jax.experimental import pallas as pl
from jax.experimental.pallas import tpu as pltpu

IN_DIM = 256
HID_DIM = 256
OUT_DIM = 128

SINGLE_TILE_ROWS = 2048   # <= this many folded rows -> one grid step
TB_MAX = 2048             # per-tile row cap on the large-M path


def _context_mlp_kernel(x_ref, w1_ref, b1_ref, w2_ref, b2_ref, o_ref):
    # x_ref: (TB, 256) tile of the folded (2B, 256) input.
    x = x_ref[...].astype(jnp.bfloat16)
    w1 = w1_ref[...].astype(jnp.bfloat16)   # no-op when weights stored in bf16
    w2 = w2_ref[...].astype(jnp.bfloat16)

    # bf16 operands + f32 accumulation -> full-rate MXU on v6e/v7x.
    h = jnp.dot(x, w1, preferred_element_type=jnp.float32)
    h = jnp.maximum(h + b1_ref[...], 0.0)                 # bias + ReLU in f32
    y = jnp.dot(h.astype(jnp.bfloat16), w2,
                preferred_element_type=jnp.float32)
    o_ref[...] = (y + b2_ref[...]).astype(o_ref.dtype)


def _ceil_div(a, b):
    return -(-a // b)


def _tile_rows(m):
    """Return (tile_rows, num_grid_steps) for the folded row count m."""
    if m <= SINGLE_TILE_ROWS:
        # One step: block equals the full array extent, so no (8,128) padding
        # and no duplicated weight DMA across cores for small/medium batches.
        return m, 1
    # Large-M path: >= 2 balanced tiles, each a multiple of 8 rows, <= ~TB_MAX.
    ntiles = max(2, _ceil_div(m, TB_MAX))
    tb = _ceil_div(_ceil_div(m, ntiles), 8) * 8
    return tb, _ceil_div(m, tb)


def context_model_forward(concat_zs, w1, b1, w2, b2):
    """concat_zs: (2, B, 256). Returns tuple (z1, z2), each (B, 128)."""
    P, B, D = concat_zs.shape
    assert P == 2 and D == IN_DIM

    M = P * B
    x = concat_zs.reshape(M, D)            # fold pair axis into M (no copy)
    tb, n_steps = _tile_rows(M)            # ragged last tile is fine (masked)

    out = pl.pallas_call(
        _context_mlp_kernel,
        out_shape=jax.ShapeDtypeStruct((M, OUT_DIM), concat_zs.dtype),
        grid=(n_steps,),
        in_specs=[
            pl.BlockSpec((tb, IN_DIM), lambda i: (i, 0)),        # x tile
            pl.BlockSpec((IN_DIM, HID_DIM), lambda i: (0, 0)),   # W1 (resident)
            pl.BlockSpec((1, HID_DIM), lambda i: (0, 0)),        # b1 (resident)
            pl.BlockSpec((HID_DIM, OUT_DIM), lambda i: (0, 0)),  # W2 (resident)
            pl.BlockSpec((1, OUT_DIM), lambda i: (0, 0)),        # b2 (resident)
        ],
        out_specs=pl.BlockSpec((tb, OUT_DIM), lambda i: (i, 0)),
        compiler_params=pltpu.CompilerParams(
            dimension_semantics=("parallel",)),                  # rows independent
    )(x, w1, b1, w2, b2)

    out = out.reshape(P, B, OUT_DIM)
    return out[0], out[1]


def init_params(key):
    """PyTorch-Linear-style init (U[-1/sqrt(fan_in), +]).

    Weights are stored persistently in bf16 (halves weight HBM bytes with no
    per-call cast); biases stay f32 for exact bias-add accuracy.
    """
    k1, k2, k3, k4 = jax.random.split(key, 4)
    lim1 = 1.0 / jnp.sqrt(IN_DIM)
    lim2 = 1.0 / jnp.sqrt(HID_DIM)
    # stored as (in, out) so the kernel does x @ W
    w1 = jax.random.uniform(k1, (IN_DIM, HID_DIM), jnp.float32, -lim1, lim1)
    b1 = jax.random.uniform(k2, (1, HID_DIM), jnp.float32, -lim1, lim1)
    w2 = jax.random.uniform(k3, (HID_DIM, OUT_DIM), jnp.float32, -lim2, lim2)
    b2 = jax.random.uniform(k4, (1, OUT_DIM), jnp.float32, -lim2, lim2)
    return w1.astype(jnp.bfloat16), b1, w2.astype(jnp.bfloat16), b2


if __name__ == "__main__":
    key = jax.random.PRNGKey(0)
    kp, kx = jax.random.split(key)
    w1, b1, w2, b2 = init_params(kp)

    B = 8  # small batch per pair element -> M = 16 folded rows, single grid step
    concat_zs = jax.random.normal(kx, (2, B, IN_DIM), jnp.float32)

    z1, z2 = context_model_forward(concat_zs, w1, b1, w2, b2)
    jax.block_until_ready((z1, z2))

    # Reference: full-f32 math on the stored parameters (weights widened back
    # to f32).  Only the kernel's bf16 activation casts contribute error, so a
    # modest tolerance covers it.
    w1f = w1.astype(jnp.float32)
    w2f = w2.astype(jnp.float32)

    def ref_fc(x):
        h = jnp.maximum(jnp.dot(x, w1f) + b1, 0.0)
        return jnp.dot(h, w2f) + b2

    r1, r2 = ref_fc(concat_zs[0]), ref_fc(concat_zs[1])
    assert z1.shape == (B, OUT_DIM) and z2.shape == (B, OUT_DIM)
    assert jnp.allclose(z1, r1, atol=2e-2, rtol=2e-2)
    assert jnp.allclose(z2, r2, atol=2e-2, rtol=2e-2)

    print("KERNEL_OK")
</pallas_src>

<mosaic_0001>
module attributes {stable_mosaic.version = 11 : i64} {
  func.func @_context_mlp_kernel(%arg0: i32, %arg1: memref<16x256xf32, #tpu.memory_space<vmem>>, %arg2: memref<256x256xbf16, #tpu.memory_space<vmem>>, %arg3: memref<1x256xf32, #tpu.memory_space<vmem>>, %arg4: memref<256x128xbf16, #tpu.memory_space<vmem>>, %arg5: memref<1x128xf32, #tpu.memory_space<vmem>>, %arg6: memref<16x128xf32, #tpu.memory_space<vmem>>) attributes {dimension_semantics = [#tpu.dimension_semantics<parallel>], iteration_bounds = array<i64: 1>, scalar_prefetch = 0 : i64, scratch_operands = 0 : i64, tpu.core_type = #tpu.core_type<tc>, window_params = [{transform_indices = @transform_0, window_bounds = array<i64: 16, 256>}, {pipeline_mode = #tpu.pipeline_mode<synchronous>, transform_indices = @transform_1, window_bounds = array<i64: 256, 256>}, {pipeline_mode = #tpu.pipeline_mode<synchronous>, transform_indices = @transform_2, window_bounds = array<i64: 1, 256>}, {pipeline_mode = #tpu.pipeline_mode<synchronous>, transform_indices = @transform_3, window_bounds = array<i64: 256, 128>}, {pipeline_mode = #tpu.pipeline_mode<synchronous>, transform_indices = @transform_4, window_bounds = array<i64: 1, 128>}, {transform_indices = @transform_5, window_bounds = array<i64: 16, 128>}]} {
    %c0 = arith.constant 0 : index
    %c0_0 = arith.constant 0 : index
    %0 = vector.load %arg1[%c0, %c0_0] : memref<16x256xf32, #tpu.memory_space<vmem>>, vector<16x256xf32>
    %1 = arith.truncf %0 : vector<16x256xf32> to vector<16x256xbf16>
    %c0_1 = arith.constant 0 : index
    %c0_2 = arith.constant 0 : index
    %2 = vector.load %arg2[%c0_1, %c0_2] : memref<256x256xbf16, #tpu.memory_space<vmem>>, vector<256x256xbf16>
    %c0_3 = arith.constant 0 : index
    %c0_4 = arith.constant 0 : index
    %3 = vector.load %arg4[%c0_3, %c0_4] : memref<256x128xbf16, #tpu.memory_space<vmem>>, vector<256x128xbf16>
    %cst = arith.constant dense<0.000000e+00> : vector<16x256xf32>
    %4 = tpu.matmul %1, %2, %cst {dimension_numbers = #tpu.dot_dimension_numbers<[1], [0], [0], [1], [0, 0, 1, 1], [], []>} : vector<16x256xbf16>, vector<256x256xbf16>, vector<16x256xf32> -> vector<16x256xf32>
    %c0_5 = arith.constant 0 : index
    %c0_6 = arith.constant 0 : index
    %5 = vector.load %arg3[%c0_5, %c0_6] : memref<1x256xf32, #tpu.memory_space<vmem>>, vector<1x256xf32>
    %6 = vector.broadcast %5 : vector<1x256xf32> to vector<16x256xf32>
    %7 = arith.addf %4, %6 : vector<16x256xf32>
    %cst_7 = arith.constant 0.000000e+00 : f32
    %8 = vector.broadcast %cst_7 : f32 to vector<16x256xf32>
    %9 = arith.maximumf %7, %8 : vector<16x256xf32>
    %10 = arith.truncf %9 : vector<16x256xf32> to vector<16x256xbf16>
    %cst_8 = arith.constant dense<0.000000e+00> : vector<16x128xf32>
    %11 = tpu.matmul %10, %3, %cst_8 {dimension_numbers = #tpu.dot_dimension_numbers<[1], [0], [0], [1], [0, 0, 1, 1], [], []>} : vector<16x256xbf16>, vector<256x128xbf16>, vector<16x128xf32> -> vector<16x128xf32>
    %c0_9 = arith.constant 0 : index
    %c0_10 = arith.constant 0 : index
    %12 = vector.load %arg5[%c0_9, %c0_10] : memref<1x128xf32, #tpu.memory_space<vmem>>, vector<1x128xf32>
    %13 = vector.broadcast %12 : vector<1x128xf32> to vector<16x128xf32>
    %14 = arith.addf %11, %13 : vector<16x128xf32>
    %c0_11 = arith.constant 0 : index
    %c0_12 = arith.constant 0 : index
    %15 = vector.load %arg6[%c0_11, %c0_12] : memref<16x128xf32, #tpu.memory_space<vmem>>, vector<16x128xf32>
    tpu.vector_store %arg6[%c0_11, %c0_12], %14 {strides = array<i32>} : memref<16x128xf32, #tpu.memory_space<vmem>>, vector<16x128xf32>,
    return
  }
  func.func @transform_0(%arg0: i32) -> (i32, i32) {
    %c0_i32 = arith.constant 0 : i32
    %c0_i32_0 = arith.constant 0 : i32
    return %arg0, %c0_i32 : i32, i32
  }
  func.func @transform_1(%arg0: i32) -> (i32, i32) {
    %c0_i32 = arith.constant 0 : i32
    %c0_i32_0 = arith.constant 0 : i32
    %c0_i32_1 = arith.constant 0 : i32
    return %c0_i32, %c0_i32_0 : i32, i32
  }
  func.func @transform_2(%arg0: i32) -> (i32, i32) {
    %c0_i32 = arith.constant 0 : i32
    %c0_i32_0 = arith.constant 0 : i32
    %c0_i32_1 = arith.constant 0 : i32
    return %c0_i32, %c0_i32_0 : i32, i32
  }
  func.func @transform_3(%arg0: i32) -> (i32, i32) {
    %c0_i32 = arith.constant 0 : i32
    %c0_i32_0 = arith.constant 0 : i32
    %c0_i32_1 = arith.constant 0 : i32
    return %c0_i32, %c0_i32_0 : i32, i32
  }
  func.func @transform_4(%arg0: i32) -> (i32, i32) {
    %c0_i32 = arith.constant 0 : i32
    %c0_i32_0 = arith.constant 0 : i32
    %c0_i32_1 = arith.constant 0 : i32
    return %c0_i32, %c0_i32_0 : i32, i32
  }
  func.func @transform_5(%arg0: i32) -> (i32, i32) {
    %c0_i32 = arith.constant 0 : i32
    %c0_i32_0 = arith.constant 0 : i32
    return %arg0, %c0_i32 : i32, i32
  }
}

</mosaic_0001>

<bundles_post_ra>
// kernel: tpu_custom_call.1
= control target key start
LH: loop header
LB: loop body
LE: loop exit
PB: predicated region body
PF: predicated region fallthrough
CT: control target
= control target key end

     0   :  { %10 = vsyncpa [#allocation3], 0  ;;  %s813_s0 = inlined_call_operand.hbm [shape: f32[16,256], index: 0, kind: input, shape index: {}]   ;;  %s814_s1 = inlined_call_operand.hbm [shape: bf16[256,256], index: 1, kind: input, shape index: {}]   ;;  %s815_s2 = inlined_call_operand.vmem [shape: f32[1,256], index: 2, kind: input, shape index: {}]   ;;  %s816_s3 = inlined_call_operand.hbm [shape: bf16[256,128], index: 3, kind: input, shape index: {}]   ;;  %s817_s4 = inlined_call_operand.vmem [shape: f32[1,128], index: 4, kind: input, shape index: {}]   ;;  %s818_s5 = inlined_call_operand.hbm [shape: f32[16,128], index: 5, kind: output, shape index: {}]  }
   0x1   :  { %11 = vsyncpa [#allocation6], 0 }
   0x2   :  { %12 = vsyncpa [#allocation4], 0  ;;  %s749_s18 = smov [#allocation5]  }
   0x3   :  { %s30_s19 = sshll.u32 %s749_s18, 4  ;;  %s31_s19 = int_to_ptr.vmem [resolvable:$true] %s30_s19 }
   0x4   :  { %s671_s20 = scalar_lea.vmem %s31_s19, 4096  ;;  %p676_p1 = scmp.lt.s32.totalorder %s31_s19, %s31_s19 }
   0x5   :  { %p672_p0 = scmp.ne.s32.totalorder %s31_s19, %s671_s20  ;;  %p677_p2 = scmp.lt.s32.totalorder %s671_s20, %s671_s20 }
   0x7   :  { %p678_p3 = por %p677_p2, %p676_p1 }
   0x9   :  { %p679_p4 = pnand %p678_p3, %p672_p0 }
   0xb   :  { %682 = shalt.err (!%p679_p4)
}
   0xc   :  { %s750_s21 = smov 128   ;;  %s751_s22 = smov 8  }
   0xd   :  { %36 = dma.hbm_to_vmem [thread:$0]  %s814_s1, 4096, %s31_s19, [#allocation6], %s750_s21, %s750_s21, %s751_s22  }
   0xe   :  { %s752_s25 = smov [#allocation2]  }
   0xf   :  { %s18_s26 = sshll.u32 %s752_s25, 4  ;;  %s19_s26 = int_to_ptr.vmem [resolvable:$true] %s18_s26 }
  0x10   :  { %s691_s27 = scalar_lea.vmem %s19_s26, 512  ;;  %p696_p6 = scmp.lt.s32.totalorder %s19_s26, %s19_s26 }
  0x11   :  { %p692_p5 = scmp.ne.s32.totalorder %s19_s26, %s691_s27  ;;  %p697_p7 = scmp.lt.s32.totalorder %s691_s27, %s691_s27 }
  0x13   :  { %p698_p8 = por %p697_p7, %p696_p6 }
  0x15   :  { %p699_p9 = pnand %p698_p8, %p692_p5 }
  0x17   :  { %702 = shalt.err (!%p699_p9)
}
  0x18   :  { %s753_s28 = smov 256   ;;  %s754_s29 = smov 16  }
  0x19   :  { %24 = dma.hbm_to_vmem [thread:$0]  %s813_s0, 512, %s19_s26, [#allocation3], %s753_s28, %s753_s28, %s754_s29  }
  0x1a   :  { %s755_s7 = smov [#allocation7]  }
  0x1b   :  { %s44_s8 = sshll.u32 %s755_s7, 4  ;;  %s45_s8 = int_to_ptr.vmem [resolvable:$true] %s44_s8 }
  0x1c   :  { %s711_s1 = scalar_lea.vmem %s45_s8, 2048  ;;  %p716_p11 = scmp.lt.s32.totalorder %s45_s8, %s45_s8 }
  0x1d   :  { %p712_p10 = scmp.ne.s32.totalorder %s45_s8, %s711_s1  ;;  %p717_p12 = scmp.lt.s32.totalorder %s711_s1, %s711_s1 }
  0x1f   :  { %p718_p13 = por %p717_p12, %p716_p11 }
  0x21   :  { %p719_p0 = pnand %p718_p13, %p712_p10 }
  0x23   :  { %722 = shalt.err (!%p719_p0)
}
  0x24   :  { %s756_s9 = smov 64   ;;  %s757_s10 = smov 4  }
  0x25   :  { %50 = dma.hbm_to_vmem [thread:$0]  %s816_s3, 2048, %s45_s8, [#allocation6], %s756_s9, %s756_s9, %s757_s10  }
  0x26   :  { %743 = dma.done.wait [#allocation3], 512  }
  0x27   :  { %744 = vsyncadd [#allocation3], 4294966784 }
  0x28   :  { %745 = dma.done.wait [#allocation6], 6144  }
  0x29   :  { %746 = vsyncadd [#allocation6], 4294961152  ;;  %v599_v0 = vld [vmem:[#allocation5 + $0x74] ss:$8 sps:$4 sm:$0xff]   ;;  %v601_v1 = vld [vmem:[#allocation5 + $0x70] ss:$8 sps:$4 sm:$0xff]   ;;  %v135_v54 = vlaneseq }
  0x2a   :  { %305 = vmatprep.subr.bf16.mxu0 %v599_v0  ;;  %v602_v2 = vld [vmem:[#allocation5 + $0x64] ss:$8 sps:$4 sm:$0xff]   ;;  %v604_v3 = vld [vmem:[#allocation5 + $0x60] ss:$8 sps:$4 sm:$0xff]   ;;  %v605_v4 = vld [vmem:[#allocation5 + $0x54] ss:$8 sps:$4 sm:$0xff]  }
  0x2b   :  { %306 = vmatpush1.bf16.msra.mxu0 %v601_v1  ;;  %v607_v5 = vld [vmem:[#allocation5 + $0x50] ss:$8 sps:$4 sm:$0xff]   ;;  %v608_v6 = vld [vmem:[#allocation5 + $0x44] ss:$8 sps:$4 sm:$0xff]   ;;  %v610_v7 = vld [vmem:[#allocation5 + $0x40] ss:$8 sps:$4 sm:$0xff]  }
  0x2c   :  { %307 = vmatprep.subr.bf16.mxu0 %v602_v2  ;;  %v611_v8 = vld [vmem:[#allocation5 + $0x34] ss:$8 sps:$4 sm:$0xff]   ;;  %v613_v9 = vld [vmem:[#allocation5 + $0x30] ss:$8 sps:$4 sm:$0xff]   ;;  %v614_v10 = vld [vmem:[#allocation5 + $0x24] ss:$8 sps:$4 sm:$0xff]  }
  0x2d   :  { %v616_v11 = vld [vmem:[#allocation5 + $0x20] ss:$8 sps:$4 sm:$0xff]   ;;  %v617_v12 = vld [vmem:[#allocation5 + $0x14] ss:$8 sps:$4 sm:$0xff]   ;;  %v619_v15 = vld [vmem:[#allocation5 + $0x10] ss:$8 sps:$4 sm:$0xff]  }
  0x2e   :  { %v64_v13 = vld [vmem:[#allocation2 + $0x8] sm:$0xff]  ;;  %v66_v14 = vld [vmem:[#allocation2 + $0x18] sm:$0xff]  ;;  %v649_v21 = vld [vmem:[#allocation7 + $0x70] sm:$0xff]   ;;  %v136_v55 = vshrl.u32 %v135_v54, 7  ;;  %s758_s14 = smov [#allocation8]  }
  0x2f   :  { %308 = vmatpush1.bf16.msra.mxu0 %v604_v3  ;;  %v620_v16 = vld [vmem:[#allocation5 + $0x4] ss:$8 sps:$4 sm:$0xff]   ;;  %v68_v17 = vpack.c.bf16 %v66_v14, %v64_v13  ;;  %v647_v18 = vld [vmem:[#allocation7 + $0x78] sm:$0xff]   ;;  %v622_v20 = vld [vmem:[#allocation5] ss:$8 sps:$4 sm:$0xff]   ;;  %s505_s15 = sshll.u32 %s758_s14, 4  ;;  %s506_s15 = int_to_ptr.vmem [resolvable:$true] %s505_s15 }
  0x30   :  { %309 = vmatprep.subr.bf16.mxu0 %v605_v4  ;;  %v648_v19 = vld [vmem:[#allocation7 + $0x38] sm:$0xff]   ;;  %567 = vmatprep.subr.bf16.mxu1 %v647_v18  ;;  %v650_v22 = vld [vmem:[#allocation7 + $0x30] sm:$0xff]   ;;  %v651_v23 = vld [vmem:[#allocation7 + $0x68] sm:$0xff]   ;;  %v141_v56 = vsub.s32 1, %v136_v55  ;;  %v137_v57 = vsub.s32 0, %v136_v55  ;;  %s723_s16 = scalar_lea.vmem %s506_s15, 256  ;;  %p728_p2 = scmp.lt.s32.totalorder %s506_s15, %s506_s15 }
  0x31   :  { %337 = vmatprep.mubr.bf16.mxu0 %v68_v17  ;;  %568 = vmatpush3.bf16.msra.mxu1 %v648_v19  ;;  %v623_v24 = vld [vmem:[#allocation5 + $0xf4] ss:$8 sps:$4 sm:$0xff]   ;;  %v625_v25 = vld [vmem:[#allocation5 + $0xf0] ss:$8 sps:$4 sm:$0xff]   ;;  %v652_v26 = vld [vmem:[#allocation7 + $0x28] sm:$0xff]   ;;  %p724_p1 = scmp.ne.s32.totalorder %s506_s15, %s723_s16  ;;  %p729_p3 = scmp.lt.s32.totalorder %s723_s16, %s723_s16 }
  0x32   :  { %569 = vmatprep.subr.bf16.mxu1 %v649_v21  ;;  %v653_v27 = vld [vmem:[#allocation7 + $0x60] sm:$0xff]   ;;  %v655_v31 = vld [vmem:[#allocation7 + $0x58] sm:$0xff]   ;;  %v65_v46 = vld [vmem:[#allocation2 + $0x10] sm:$0xff] }
  0x33   :  { %310 = vmatpush1.bf16.msra.mxu0 %v607_v5  ;;  %v626_v28 = vld [vmem:[#allocation5 + $0xe4] ss:$8 sps:$4 sm:$0xff]   ;;  %v628_v30 = vld [vmem:[#allocation5 + $0xe0] ss:$8 sps:$4 sm:$0xff]   ;;  %v629_v32 = vld [vmem:[#allocation5 + $0xd4] ss:$8 sps:$4 sm:$0xff]   ;;  %p730_p4 = por %p729_p3, %p728_p2 }
  0x34   :  { %311 = vmatprep.subr.bf16.mxu0 %v608_v6  ;;  %v654_v29 = vld [vmem:[#allocation7 + $0x20] sm:$0xff]   ;;  %v656_v33 = vld [vmem:[#allocation7 + $0x18] sm:$0xff]   ;;  %v657_v48 = vld [vmem:[#allocation7 + $0x50] sm:$0xff]  }
  0x35   :  { %570 = vmatpush3.bf16.msra.mxu1 %v650_v22  ;;  %v631_v34 = vld [vmem:[#allocation5 + $0xd0] ss:$8 sps:$4 sm:$0xff]   ;;  %v632_v35 = vld [vmem:[#allocation5 + $0xc4] ss:$8 sps:$4 sm:$0xff]   ;;  %v634_v36 = vld [vmem:[#allocation5 + $0xc0] ss:$8 sps:$4 sm:$0xff]   ;;  %p731_p5 = pnand %p730_p4, %p724_p1 }
  0x36   :  { %571 = vmatprep.subr.bf16.mxu1 %v651_v23  ;;  %v635_v37 = vld [vmem:[#allocation5 + $0xb4] ss:$8 sps:$4 sm:$0xff]   ;;  %v637_v38 = vld [vmem:[#allocation5 + $0xb0] ss:$8 sps:$4 sm:$0xff]   ;;  %v638_v39 = vld [vmem:[#allocation5 + $0xa4] ss:$8 sps:$4 sm:$0xff]  }
  0x37   :  { %312 = vmatpush1.bf16.msra.mxu0 %v610_v7  ;;  %v640_v40 = vld [vmem:[#allocation5 + $0xa0] ss:$8 sps:$4 sm:$0xff]   ;;  %v641_v41 = vld [vmem:[#allocation5 + $0x94] ss:$8 sps:$4 sm:$0xff]   ;;  %v643_v42 = vld [vmem:[#allocation5 + $0x90] ss:$8 sps:$4 sm:$0xff]  }
  0x38   :  { %313 = vmatprep.subr.bf16.mxu0 %v611_v8  ;;  %v644_v43 = vld [vmem:[#allocation5 + $0x84] ss:$8 sps:$4 sm:$0xff]   ;;  %v646_v44 = vld [vmem:[#allocation5 + $0x80] ss:$8 sps:$4 sm:$0xff]   ;;  %v658_v49 = vld [vmem:[#allocation7 + $0x10] sm:$0xff]  }
  0x39   :  { %572 = vmatpush3.bf16.msra.mxu1 %v652_v26  ;;  %v63_v45 = vld [vmem:[#allocation2] sm:$0xff]  ;;  %v659_v50 = vld [vmem:[#allocation7 + $0x48] sm:$0xff]  }
  0x3a   :  { %573 = vmatprep.subr.bf16.mxu1 %v653_v27  ;;  %v67_v47 = vpack.c.bf16 %v65_v46, %v63_v45  ;;  %v660_v51 = vld [vmem:[#allocation7 + $0x8] sm:$0xff]   ;;  %v661_v52 = vld [vmem:[#allocation7 + $0x40] sm:$0xff]  }
  0x3b   :  { %314 = vmatpush1.bf16.msra.mxu0 %v613_v9  ;;  %v662_v53 = vld [vmem:[#allocation7] sm:$0xff]  }
  0x3c   :  { %315 = vmatprep.subr.bf16.mxu0 %v614_v10  ;;  %v133_v58 = vld [vmem:[%s815_s2] sm:$0x3] }
  0x3d   :  { %574 = vmatpush3.bf16.msra.mxu1 %v654_v29  ;;  %v142_v60 = vrot.slane %v133_v58, %v141_v56  ;;  %v138_v61 = vrot.slane %v133_v58, %v137_v57 }
  0x3e   :  { %575 = vmatprep.subr.bf16.mxu1 %v655_v31 }
  0x3f   :  { %316 = vmatpush1.bf16.msra.mxu0 %v616_v11 }
  0x40   :  { %317 = vmatprep.subr.bf16.mxu0 %v617_v12  ;;  %v550_v12 = vld [vmem:[%s817_s4] ss:$0 sm:$0xff] }
  0x41   :  { %576 = vmatpush3.bf16.msra.mxu1 %v656_v33 }
  0x42   :  { %577 = vmatprep.subr.bf16.mxu1 %v657_v48 }
  0x43   :  { %318 = vmatpush1.bf16.msra.mxu0 %v619_v15 }
  0x44   :  { %319 = vmatprep.subr.bf16.mxu0 %v620_v16 }
  0x45   :  { %578 = vmatpush3.bf16.msra.mxu1 %v658_v49 }
  0x46   :  { %579 = vmatprep.subr.bf16.mxu1 %v659_v50 }
  0x47   :  { %320 = vmatpush1.bf16.msra.mxu0 %v622_v20 }
  0x48   :  { %321 = vmatprep.subr.bf16.mxu0 %v623_v24 }
  0x49   :  { %580 = vmatpush3.bf16.msra.mxu1 %v660_v51 }
  0x4a   :  { %581 = vmatprep.subr.bf16.mxu1 %v661_v52 }
  0x4b   :  { %322 = vmatpush2.bf16.msra.mxu0 %v625_v25 }
  0x4c   :  { %323 = vmatprep.subr.bf16.mxu0 %v626_v28 }
  0x4d   :  { %582 = vmatpush3.bf16.msra.mxu1 %v662_v53 }
  0x4f   :  { %324 = vmatpush2.bf16.msra.mxu0 %v628_v30 }
  0x50   :  { %325 = vmatprep.subr.bf16.mxu0 %v629_v32 }
  0x53   :  { %326 = vmatpush2.bf16.msra.mxu0 %v631_v34 }
  0x54   :  { %327 = vmatprep.subr.bf16.mxu0 %v632_v35 }
  0x57   :  { %328 = vmatpush2.bf16.msra.mxu0 %v634_v36 }
  0x58   :  { %329 = vmatprep.subr.bf16.mxu0 %v635_v37 }
  0x5b   :  { %330 = vmatpush2.bf16.msra.mxu0 %v637_v38 }
  0x5c   :  { %331 = vmatprep.subr.bf16.mxu0 %v638_v39 }
  0x5f   :  { %332 = vmatpush2.bf16.msra.mxu0 %v640_v40 }
  0x60   :  { %333 = vmatprep.subr.bf16.mxu0 %v641_v41 }
  0x63   :  { %334 = vmatpush2.bf16.msra.mxu0 %v643_v42 }
  0x64   :  { %335 = vmatprep.subr.bf16.mxu0 %v644_v43 }
  0x67   :  { %336 = vmatpush2.bf16.msra.mxu0 %v646_v44 }
  0x6a   :  { %338 = vmatmul.mubr.bf16.vlgmr.msra.gmra.mxu0 %v67_v47 }
 0x12a   :  { %v339_v59 = vpop.f32.mrf.mxu0 }
 0x12b   :  { %v340_v2 = vadd.f32 %v339_v59, %v138_v61 }
 0x12c   :  { %v341_v62 = vpop.f32.mrf.mxu0 }
 0x12d   :  { %v342_v0 = vadd.f32 %v341_v62, %v142_v60  ;;  %v348_v8 = vmax.f32 %v340_v2, 0.0 }
 0x12e   :  { %v343_v63 = vpop.f32.mrf.mxu0 }
 0x12f   :  { %v344_v1 = vadd.f32 %v343_v63, %v138_v61  ;;  %v349_v6 = vmax.f32 %v342_v0, 0.0 }
 0x130   :  { %v345_v3 = vpop.f32.mrf.mxu0 }
 0x131   :  { %v346_v4 = vadd.f32 %v345_v3, %v142_v60  ;;  %v350_v5 = vmax.f32 %v344_v1, 0.0 }
 0x133   :  { %v351_v7 = vmax.f32 %v346_v4, 0.0  ;;  %v352_v10 = vpack.c.bf16 %v350_v5, %v348_v8 }
 0x135   :  { %v353_v9 = vpack.c.bf16 %v351_v7, %v349_v6 }
 0x137   :  { %489 = vmatprep.mubr.bf16.mxu1 %v353_v9 }
 0x138   :  { %490 = vmatmul.mubr.bf16.vlgmr.msra.gmra.mxu1 %v352_v10 }
 0x1f8   :  { %v583_v11 = vpop.f32.mrf.mxu1 }
 0x1fa   :  { %v584_v13 = vpop.f32.mrf.mxu1 }
 0x1fb   :  { %v585_v14 = vadd.f32 %v584_v13, %v583_v11 }
 0x1fc   :  { %v586_v15 = vpop.f32.mrf.mxu1 }
 0x1fd   :  { %v492_v16 = vadd.f32 %v585_v14, %v550_v12 }
 0x1fe   :  { %v587_v17 = vpop.f32.mrf.mxu1 }
 0x1ff   :  { %498 = vst [vmem:[#allocation8] sm:$0xff] %v492_v16  ;;  %v588_v18 = vadd.f32 %v587_v17, %v586_v15 }
 0x201   :  { %v495_v19 = vadd.f32 %v588_v18, %v550_v12 }
 0x203   :  { %499 = vst [vmem:[#allocation8 + $0x8] sm:$0xff] %v495_v19 }
 0x204   :  { %734 = shalt.err (!%p731_p5)
}
 0x205   :  { %511 = dma.vmem_to_hbm [thread:$0]  %s506_s15, 256, %s818_s5, [#allocation4], %s750_s21, %s750_s21, %s751_s22  }
 0x206   :  { %747 = dma.done.wait [#allocation4], 256  }
 0x207   :  { %748 = vsyncadd [#allocation4], 4294967040 }
 0x208   :  { %515 = vsyncpa [#allocation3], 1 }
 0x209   :  { %516 = vsyncpa [#allocation6], 1 }
 0x20a   :  { %517 = vsyncpa [#allocation4], 1 }

</bundles_post_ra>
